<compile_context>
chip_gen: v7x
topology: tpu7x:2x2x1
jax: 0.10.0
libtpu: 0.0.40
codegen_flags: <defaults>
</compile_context>

<pallas_src>
import jax
import jax.numpy as jnp
from jax.experimental import pallas as pl
from jax.experimental.pallas import tpu as pltpu


def rnn_kernel(x_ref, h0_ref, w_ref, out_ref, hn_ref):
    """Elman RNN (tanh) + deferred Linear head, time-major.

    x_ref:   (S, B)     input sequence (input_size == 1, squeezed), time-major
    h0_ref:  (B, H)     initial hidden state (aliased with hn output buffer)
    w_ref:   (H+4, H)   packed weights:
                          rows [0:H]   = W_hh^T
                          row  H       = W_ih^T row (since I == 1)
                          row  H+1     = b_ih + b_hh
                          row  H+2     = W_out row
                          row  H+3     = b_out broadcast across lanes
    out_ref: (S, B)     per-step Linear outputs, time-major
    hn_ref:  (B, H)     final hidden state
    """
    S, B = x_ref.shape
    H = hn_ref.shape[1]

    whh_t = w_ref[0:H, :]                 # (H, H)
    wih = w_ref[H:H + 1, :]               # (1, H)
    b = w_ref[H + 1:H + 2, :]             # (1, H)
    wout = w_ref[H + 2:H + 3, :]          # (1, H)
    bout = w_ref[H + 3:H + 4, 0:1]        # (1, 1)

    x = x_ref[...]                        # (S, B)

    # Hoisted input projection + combined bias for all timesteps (pure VPU),
    # laid out time-major so the per-step read is a leading-axis index.
    xw = x[:, :, None] * wih[None, :, :] + b[None, :, :]        # (S, B, H)

    # Serial recurrence: only h @ W_hh^T + tanh stays in the loop.
    # S is small and static -> full unroll.  (Switch to lax.fori_loop with an
    # (S, B, H) VMEM history scratch if S grows beyond ~64.)
    h = h0_ref[...]                                              # (B, H)
    hs = []
    for t in range(S):
        h = jnp.tanh(xw[t]
                     + jnp.dot(h, whh_t, preferred_element_type=jnp.float32))
        hs.append(h)

    # Deferred Linear head: axis-0 stack (contiguous tile writes, no sublane
    # interleave) + one lane-dim reduction (XLU slot, otherwise idle).
    h_all = jnp.stack(hs, axis=0)                                # (S, B, H)
    y = jnp.sum(h_all * wout[None, :, :], axis=-1) + bout        # (S, B)

    out_ref[...] = y.astype(out_ref.dtype)
    hn_ref[...] = h.astype(hn_ref.dtype)


@jax.jit
def rnn_forward(x, h_state, params):
    """Mirrors RNN.forward(x, h_state) -> (outs, h_state).

    x:       (B, S, 1) float32
    h_state: (1, B, 32) float32 or None
    returns: outs (B, S, 1), h_state (1, B, 32)
    """
    B, S, I = x.shape
    H = params["w_hh"].shape[0]
    assert I == 1, "module is defined with input_size=1"

    # Single packed weight slab -> one DMA instead of five small ones.
    wpack = jnp.concatenate(
        [
            params["w_hh"].T,                                     # (H, H)
            params["w_ih"].T.reshape(1, H),                       # (1, H)
            (params["b_ih"] + params["b_hh"]).reshape(1, H),      # (1, H)
            params["w_out"].reshape(1, H),                        # (1, H)
            jnp.broadcast_to(params["b_out"].reshape(1, 1), (1, H)),
        ],
        axis=0,
    ).astype(jnp.float32)                                         # (H+4, H)

    if h_state is None:
        h0 = jnp.zeros((B, H), jnp.float32)
    else:
        h0 = h_state.reshape(B, H).astype(jnp.float32)

    x_sb = x.reshape(B, S).T.astype(jnp.float32)                  # (S, B)

    vmem = pl.BlockSpec(memory_space=pltpu.MemorySpace.VMEM)

    y_sb, hn = pl.pallas_call(
        rnn_kernel,
        out_shape=(
            jax.ShapeDtypeStruct((S, B), jnp.float32),
            jax.ShapeDtypeStruct((B, H), jnp.float32),
        ),
        in_specs=[vmem, vmem, vmem],
        out_specs=(vmem, vmem),
        input_output_aliases={1: 1},   # h0 buffer reused for hn
    )(x_sb, h0, wpack)

    outs = y_sb.T[:, :, None].astype(x.dtype)                     # (B, S, 1)
    return outs, hn.reshape(1, B, H)


def init_params(key, input_size=1, hidden_size=32, out_size=1):
    """Deterministic parameter init (PyTorch-style uniform(-1/sqrt(H), 1/sqrt(H)))."""
    k = jax.random.split(key, 6)
    s = 1.0 / jnp.sqrt(hidden_size)
    return {
        "w_ih": jax.random.uniform(k[0], (hidden_size, input_size), jnp.float32, -s, s),
        "w_hh": jax.random.uniform(k[1], (hidden_size, hidden_size), jnp.float32, -s, s),
        "b_ih": jax.random.uniform(k[2], (hidden_size,), jnp.float32, -s, s),
        "b_hh": jax.random.uniform(k[3], (hidden_size,), jnp.float32, -s, s),
        "w_out": jax.random.uniform(k[4], (out_size, hidden_size), jnp.float32, -s, s),
        "b_out": jax.random.uniform(k[5], (out_size,), jnp.float32, -s, s),
    }


def rnn_forward_ref(x, h_state, params):
    """Pure-JAX reference (lax.scan) for correctness checking."""
    B, S, I = x.shape
    H = params["w_hh"].shape[0]
    h0 = jnp.zeros((B, H), jnp.float32) if h_state is None else h_state.reshape(B, H)

    def step(h, x_t):
        h_new = jnp.tanh(x_t @ params["w_ih"].T + params["b_ih"]
                         + h @ params["w_hh"].T + params["b_hh"])
        y = h_new @ params["w_out"].T + params["b_out"]
        return h_new, y

    hn, ys = jax.lax.scan(step, h0, jnp.transpose(x, (1, 0, 2)))   # ys: (S, B, 1)
    return jnp.transpose(ys, (1, 0, 2)), hn.reshape(1, B, H)


if __name__ == "__main__":
    B, S, I, H = 2, 8, 1, 32

    key = jax.random.PRNGKey(0)
    k_param, k_x = jax.random.split(key)
    params = init_params(k_param, input_size=I, hidden_size=H, out_size=1)
    x = jax.random.normal(k_x, (B, S, I), jnp.float32)
    h_state = None   # matches the script's `h_state = None` first call

    outs, hn = rnn_forward(x, h_state, params)
    outs = jax.block_until_ready(outs)
    hn = jax.block_until_ready(hn)

    outs_ref, hn_ref = rnn_forward_ref(x, h_state, params)
    assert outs.shape == (B, S, 1) and hn.shape == (1, B, H)
    assert jnp.allclose(outs, outs_ref, atol=1e-5, rtol=1e-5)
    assert jnp.allclose(hn, hn_ref, atol=1e-5, rtol=1e-5)

    # Second call feeding the returned hidden state back in (like the script).
    outs2, hn2 = rnn_forward(x, hn, params)
    outs2 = jax.block_until_ready(outs2)
    outs2_ref, hn2_ref = rnn_forward_ref(x, hn_ref, params)
    assert jnp.allclose(outs2, outs2_ref, atol=1e-5, rtol=1e-5)
    assert jnp.allclose(hn2, hn2_ref, atol=1e-5, rtol=1e-5)

    print("KERNEL_OK")
</pallas_src>

<mosaic_0001>
module attributes {stable_mosaic.version = 11 : i64} {
  func.func @rnn_kernel(%arg0: memref<8x2xf32, #tpu.memory_space<vmem>>, %arg1: memref<2x32xf32, #tpu.memory_space<vmem>>, %arg2: memref<36x32xf32, #tpu.memory_space<vmem>>, %arg3: memref<8x2xf32, #tpu.memory_space<vmem>>, %arg4: memref<2x32xf32, #tpu.memory_space<vmem>>) attributes {dimension_semantics = [], scalar_prefetch = 0 : i64, scratch_operands = 0 : i64, tpu.core_type = #tpu.core_type<tc>} {
    %c0 = arith.constant 0 : index
    %c0_0 = arith.constant 0 : index
    %0 = vector.load %arg2[%c0, %c0_0] : memref<36x32xf32, #tpu.memory_space<vmem>>, vector<32x32xf32>
    %c32 = arith.constant 32 : index
    %c0_1 = arith.constant 0 : index
    %1 = vector.load %arg2[%c32, %c0_1] : memref<36x32xf32, #tpu.memory_space<vmem>>, vector<1x32xf32>
    %c33 = arith.constant 33 : index
    %c0_2 = arith.constant 0 : index
    %2 = vector.load %arg2[%c33, %c0_2] : memref<36x32xf32, #tpu.memory_space<vmem>>, vector<1x32xf32>
    %c34 = arith.constant 34 : index
    %c0_3 = arith.constant 0 : index
    %3 = vector.load %arg2[%c34, %c0_3] : memref<36x32xf32, #tpu.memory_space<vmem>>, vector<1x32xf32>
    %c35 = arith.constant 35 : index
    %c0_4 = arith.constant 0 : index
    %4 = vector.load %arg2[%c35, %c0_4] : memref<36x32xf32, #tpu.memory_space<vmem>>, vector<1x1xf32>
    %c0_5 = arith.constant 0 : index
    %c0_6 = arith.constant 0 : index
    %5 = vector.load %arg0[%c0_5, %c0_6] : memref<8x2xf32, #tpu.memory_space<vmem>>, vector<8x2xf32>
    %6 = vector.shape_cast %5 : vector<8x2xf32> to vector<8x2x1xf32>
    %7 = vector.shape_cast %1 : vector<1x32xf32> to vector<1x1x32xf32>
    %8 = vector.broadcast %6 : vector<8x2x1xf32> to vector<8x2x32xf32>
    %9 = vector.broadcast %7 : vector<1x1x32xf32> to vector<8x2x32xf32>
    %10 = arith.mulf %8, %9 : vector<8x2x32xf32>
    %11 = vector.shape_cast %2 : vector<1x32xf32> to vector<1x1x32xf32>
    %12 = vector.broadcast %11 : vector<1x1x32xf32> to vector<8x2x32xf32>
    %13 = arith.addf %10, %12 : vector<8x2x32xf32>
    %c0_7 = arith.constant 0 : index
    %c0_8 = arith.constant 0 : index
    %14 = vector.load %arg1[%c0_7, %c0_8] : memref<2x32xf32, #tpu.memory_space<vmem>>, vector<2x32xf32>
    %15 = vector.extract_strided_slice %13 {offsets = [0, 0, 0], sizes = [1, 2, 32], strides = [1, 1, 1]} : vector<8x2x32xf32> to vector<1x2x32xf32>
    %16 = vector.shape_cast %15 : vector<1x2x32xf32> to vector<2x32xf32>
    %cst = arith.constant dense<0.000000e+00> : vector<2x32xf32>
    %17 = tpu.matmul %14, %0, %cst {dimension_numbers = #tpu.dot_dimension_numbers<[1], [0], [0], [1], [0, 0, 1, 1], [], []>} : vector<2x32xf32>, vector<32x32xf32>, vector<2x32xf32> -> vector<2x32xf32>
    %18 = arith.addf %16, %17 : vector<2x32xf32>
    %19 = math.tanh %18 : vector<2x32xf32>
    %20 = vector.extract_strided_slice %13 {offsets = [1, 0, 0], sizes = [1, 2, 32], strides = [1, 1, 1]} : vector<8x2x32xf32> to vector<1x2x32xf32>
    %21 = vector.shape_cast %20 : vector<1x2x32xf32> to vector<2x32xf32>
    %cst_9 = arith.constant dense<0.000000e+00> : vector<2x32xf32>
    %22 = tpu.matmul %19, %0, %cst_9 {dimension_numbers = #tpu.dot_dimension_numbers<[1], [0], [0], [1], [0, 0, 1, 1], [], []>} : vector<2x32xf32>, vector<32x32xf32>, vector<2x32xf32> -> vector<2x32xf32>
    %23 = arith.addf %21, %22 : vector<2x32xf32>
    %24 = math.tanh %23 : vector<2x32xf32>
    %25 = vector.extract_strided_slice %13 {offsets = [2, 0, 0], sizes = [1, 2, 32], strides = [1, 1, 1]} : vector<8x2x32xf32> to vector<1x2x32xf32>
    %26 = vector.shape_cast %25 : vector<1x2x32xf32> to vector<2x32xf32>
    %cst_10 = arith.constant dense<0.000000e+00> : vector<2x32xf32>
    %27 = tpu.matmul %24, %0, %cst_10 {dimension_numbers = #tpu.dot_dimension_numbers<[1], [0], [0], [1], [0, 0, 1, 1], [], []>} : vector<2x32xf32>, vector<32x32xf32>, vector<2x32xf32> -> vector<2x32xf32>
    %28 = arith.addf %26, %27 : vector<2x32xf32>
    %29 = math.tanh %28 : vector<2x32xf32>
    %30 = vector.extract_strided_slice %13 {offsets = [3, 0, 0], sizes = [1, 2, 32], strides = [1, 1, 1]} : vector<8x2x32xf32> to vector<1x2x32xf32>
    %31 = vector.shape_cast %30 : vector<1x2x32xf32> to vector<2x32xf32>
    %cst_11 = arith.constant dense<0.000000e+00> : vector<2x32xf32>
    %32 = tpu.matmul %29, %0, %cst_11 {dimension_numbers = #tpu.dot_dimension_numbers<[1], [0], [0], [1], [0, 0, 1, 1], [], []>} : vector<2x32xf32>, vector<32x32xf32>, vector<2x32xf32> -> vector<2x32xf32>
    %33 = arith.addf %31, %32 : vector<2x32xf32>
    %34 = math.tanh %33 : vector<2x32xf32>
    %35 = vector.extract_strided_slice %13 {offsets = [4, 0, 0], sizes = [1, 2, 32], strides = [1, 1, 1]} : vector<8x2x32xf32> to vector<1x2x32xf32>
    %36 = vector.shape_cast %35 : vector<1x2x32xf32> to vector<2x32xf32>
    %cst_12 = arith.constant dense<0.000000e+00> : vector<2x32xf32>
    %37 = tpu.matmul %34, %0, %cst_12 {dimension_numbers = #tpu.dot_dimension_numbers<[1], [0], [0], [1], [0, 0, 1, 1], [], []>} : vector<2x32xf32>, vector<32x32xf32>, vector<2x32xf32> -> vector<2x32xf32>
    %38 = arith.addf %36, %37 : vector<2x32xf32>
    %39 = math.tanh %38 : vector<2x32xf32>
    %40 = vector.extract_strided_slice %13 {offsets = [5, 0, 0], sizes = [1, 2, 32], strides = [1, 1, 1]} : vector<8x2x32xf32> to vector<1x2x32xf32>
    %41 = vector.shape_cast %40 : vector<1x2x32xf32> to vector<2x32xf32>
    %cst_13 = arith.constant dense<0.000000e+00> : vector<2x32xf32>
    %42 = tpu.matmul %39, %0, %cst_13 {dimension_numbers = #tpu.dot_dimension_numbers<[1], [0], [0], [1], [0, 0, 1, 1], [], []>} : vector<2x32xf32>, vector<32x32xf32>, vector<2x32xf32> -> vector<2x32xf32>
    %43 = arith.addf %41, %42 : vector<2x32xf32>
    %44 = math.tanh %43 : vector<2x32xf32>
    %45 = vector.extract_strided_slice %13 {offsets = [6, 0, 0], sizes = [1, 2, 32], strides = [1, 1, 1]} : vector<8x2x32xf32> to vector<1x2x32xf32>
    %46 = vector.shape_cast %45 : vector<1x2x32xf32> to vector<2x32xf32>
    %cst_14 = arith.constant dense<0.000000e+00> : vector<2x32xf32>
    %47 = tpu.matmul %44, %0, %cst_14 {dimension_numbers = #tpu.dot_dimension_numbers<[1], [0], [0], [1], [0, 0, 1, 1], [], []>} : vector<2x32xf32>, vector<32x32xf32>, vector<2x32xf32> -> vector<2x32xf32>
    %48 = arith.addf %46, %47 : vector<2x32xf32>
    %49 = math.tanh %48 : vector<2x32xf32>
    %50 = vector.extract_strided_slice %13 {offsets = [7, 0, 0], sizes = [1, 2, 32], strides = [1, 1, 1]} : vector<8x2x32xf32> to vector<1x2x32xf32>
    %51 = vector.shape_cast %50 : vector<1x2x32xf32> to vector<2x32xf32>
    %cst_15 = arith.constant dense<0.000000e+00> : vector<2x32xf32>
    %52 = tpu.matmul %49, %0, %cst_15 {dimension_numbers = #tpu.dot_dimension_numbers<[1], [0], [0], [1], [0, 0, 1, 1], [], []>} : vector<2x32xf32>, vector<32x32xf32>, vector<2x32xf32> -> vector<2x32xf32>
    %53 = arith.addf %51, %52 : vector<2x32xf32>
    %54 = math.tanh %53 : vector<2x32xf32>
    %55 = vector.shape_cast %19 : vector<2x32xf32> to vector<1x2x32xf32>
    %56 = vector.shape_cast %24 : vector<2x32xf32> to vector<1x2x32xf32>
    %57 = vector.shape_cast %29 : vector<2x32xf32> to vector<1x2x32xf32>
    %58 = vector.shape_cast %34 : vector<2x32xf32> to vector<1x2x32xf32>
    %59 = vector.shape_cast %39 : vector<2x32xf32> to vector<1x2x32xf32>
    %60 = vector.shape_cast %44 : vector<2x32xf32> to vector<1x2x32xf32>
    %61 = vector.shape_cast %49 : vector<2x32xf32> to vector<1x2x32xf32>
    %62 = vector.shape_cast %54 : vector<2x32xf32> to vector<1x2x32xf32>
    %63 = tpu.concatenate %55, %56, %57, %58, %59, %60, %61, %62 in 0 : vector<1x2x32xf32>, vector<1x2x32xf32>, vector<1x2x32xf32>, vector<1x2x32xf32>, vector<1x2x32xf32>, vector<1x2x32xf32>, vector<1x2x32xf32>, vector<1x2x32xf32> -> vector<8x2x32xf32>
    %64 = vector.shape_cast %3 : vector<1x32xf32> to vector<1x1x32xf32>
    %65 = vector.broadcast %64 : vector<1x1x32xf32> to vector<8x2x32xf32>
    %66 = arith.mulf %63, %65 : vector<8x2x32xf32>
    %cst_16 = arith.constant dense<0.000000e+00> : vector<8x2xf32>
    %67 = vector.multi_reduction <add>, %66, %cst_16 [2] : vector<8x2x32xf32> to vector<8x2xf32>
    %68 = vector.broadcast %4 : vector<1x1xf32> to vector<8x2xf32>
    %69 = arith.addf %67, %68 : vector<8x2xf32>
    %c0_17 = arith.constant 0 : index
    %c0_18 = arith.constant 0 : index
    %70 = vector.load %arg3[%c0_17, %c0_18] : memref<8x2xf32, #tpu.memory_space<vmem>>, vector<8x2xf32>
    tpu.vector_store %arg3[%c0_17, %c0_18], %69 {strides = array<i32>} : memref<8x2xf32, #tpu.memory_space<vmem>>, vector<8x2xf32>,
    %c0_19 = arith.constant 0 : index
    %c0_20 = arith.constant 0 : index
    %71 = vector.load %arg4[%c0_19, %c0_20] : memref<2x32xf32, #tpu.memory_space<vmem>>, vector<2x32xf32>
    tpu.vector_store %arg4[%c0_19, %c0_20], %54 {strides = array<i32>} : memref<2x32xf32, #tpu.memory_space<vmem>>, vector<2x32xf32>,
    return
  }
}

</mosaic_0001>

<bundles_post_ra>
// kernel: rnn_forward.1
= control target key start
LH: loop header
LB: loop body
LE: loop exit
PB: predicated region body
PF: predicated region fallthrough
CT: control target
= control target key end

     0   :  { %v1032_v0 = vmov 0.0|0.0   ;;  %vm1033_vm0 = vmmov 0   ;;  %v1034_v4 = vmov 0.0   ;;  %v25_v5 = vlaneseq  ;;  %s1208_s2 = inlined_call_operand.vmem [shape: f32[36,32], index: 2, kind: input, shape index: {}]   ;;  %s1209_s0 = inlined_call_operand.vmem [shape: f32[8,2], index: 0, kind: input, shape index: {}]   ;;  %s1210_s1 = inlined_call_operand.vmem [shape: f32[2,32], index: 1, kind: input, shape index: {}, may-alias: {1,4}]   ;;  %s1211_s4 = inlined_call_operand.vmem [shape: f32[2,32], index: 4, kind: output, shape index: {1}, may-alias: {1,4}]   ;;  %s1212_s3 = inlined_call_operand.vmem [shape: f32[8,2], index: 3, kind: output, shape index: {0}]  }
   0x1   :  { %963 = vmatprep.subr.bf16.mxu0 %v1032_v0  ;;  %v16_v1 = vld [vmem:[%s1208_s2] sm:$0xff]  ;;  %v17_v2 = vld [vmem:[%s1208_s2 + $0x8] sm:$0xff]  ;;  %v18_v3 = vld [vmem:[%s1208_s2 + $0x10] sm:$0xff]  ;;  %883 = vmatprep.mubr.msk.f32.mxu0 %vm1033_vm0, %v1034_v4  ;;  %vm106_vm1 = vcmask 261120   ;;  %vm719_vm2 = vcmask 254976   ;;  %vm798_vm3 = vcmask 1041409  }
   0x2   :  { %v1072_v6 = vpack.c.bf16 %v17_v2, %v16_v1  ;;  %v19_v7 = vld [vmem:[%s1208_s2 + $0x18] sm:$0xff]  ;;  %969 = vmatprep.subr.bf16.mxu1 %v1032_v0  ;;  %894 = vmatprep.mubr.msk.f32.mxu1 %vm1033_vm0, %v1034_v4  ;;  %v1081_v8 = vshrl.u32 %v25_v5, 7  ;;  %v24_v10 = vld [vmem:[%s1209_s0] sm:$0xff]  ;;  %vm800_vm4 = vcmask 1042434   ;;  %vm802_vm5 = vcmask 1043459  }
   0x3   :  { %v1084_v9 = vpack.c.bf16 %v19_v7, %v18_v3  ;;  %v105_v14 = vld [vmem:[%s1210_s1] sm:$0x3]  ;;  %v23_v20 = vld [vmem:[%s1208_s2 + $0x23] sm:$0x1]  ;;  %v1128_v29 = vld [vmem:[%s1208_s2 + $0x22] ss:$0 sm:$0xff] }
   0x4   :  { %965 = vmatpush3.bf16.msra.mxu0 %v1072_v6  ;;  %971 = vmatpush3.bf16.msra.mxu1 %v1072_v6  ;;  %v27_v11 = vsub.s32 0, %v1081_v8  ;;  %v34_v12 = vsub.s32 1, %v1081_v8  ;;  %v55_v16 = vsub.s32 4, %v1081_v8  ;;  %v69_v18 = vsub.s32 6, %v1081_v8  ;;  %1011 = vpush %v23_v20  ;;  %v1116_v21 = vld [vmem:[%s1208_s2 + $0x20] ss:$0 sm:$0xff] }
   0x5   :  { %966 = vmatprep.subr.bf16.mxu0 %v1032_v0  ;;  %972 = vmatprep.subr.bf16.mxu1 %v1032_v0  ;;  %v1122_v24 = vld [vmem:[%s1208_s2 + $0x21] ss:$0 sm:$0xff]  ;;  %v41_v33 = vsub.s32 2, %v1081_v8  ;;  %v48_v34 = vsub.s32 3, %v1081_v8  ;;  %v62_v37 = vsub.s32 5, %v1081_v8  ;;  %v76_v39 = vsub.s32 7, %v1081_v8 }
   0x6   :  { %v28_v13 = vrot.slane %v24_v10, %v27_v11  ;;  %v35_v15 = vrot.slane %v24_v10, %v34_v12  ;;  %v56_v17 = vrot.slane %v24_v10, %v55_v16  ;;  %v70_v19 = vrot.slane %v24_v10, %v69_v18 }
   0x7   :  { %v42_v35 = vrot.slane %v24_v10, %v41_v33  ;;  %v49_v36 = vrot.slane %v24_v10, %v48_v34  ;;  %v63_v38 = vrot.slane %v24_v10, %v62_v37  ;;  %v77_v40 = vrot.slane %v24_v10, %v76_v39 }
   0x8   :  { %968 = vmatpush3.bf16.msra.mxu0 %v1084_v9  ;;  %974 = vmatpush3.bf16.msra.mxu1 %v1084_v9  ;;  %vm804_vm6 = vcmask 1044484   ;;  %vm806_vm7 = vcmask 1045509   ;;  %vm808_vm8 = vcmask 1046534   ;;  %vm810_vm9 = vcmask 1047559  }
   0x9   :  { %30 = vbcast.lane.b32.xlu0 %v28_v13, 256  ;;  %975 = vmatprep.subr.bf16.mxu0 %v1032_v0  ;;  %vm813_vm10 = vcmask 15360  }
   0xa   :  { %981 = vmatprep.subr.bf16.mxu1 %v1032_v0  ;;  %44 = vbcast.lane.b32.xlu1 %v42_v35, 256 }
   0xb   :  { %884 = vmatmul.mubr.msk.f32.vlgmr.msra.gmra.mrb[0].mxu0 %vm106_vm1, %v105_v14 }
   0xc   :  { %977 = vmatpush3.bf16.msra.mxu0 %v1072_v6  ;;  %905 = vmatprep.mubr.msk.f32.mxu0 %vm1033_vm0, %v1034_v4 }
   0xd   :  { %37 = vbcast.lane.b32.xlu0 %v35_v15, 256  ;;  %978 = vmatprep.subr.bf16.mxu0 %v1032_v0 }
   0xe   :  { %51 = vbcast.lane.b32.xlu1 %v49_v36, 256 }
  0x10   :  { %980 = vmatpush3.bf16.msra.mxu0 %v1084_v9 }
  0x11   :  { %58 = vbcast.lane.b32.xlu0 %v56_v17, 256  ;;  %987 = vmatprep.subr.bf16.mxu0 %v1032_v0 }
  0x12   :  { %65 = vbcast.lane.b32.xlu1 %v63_v38, 256 }
  0x15   :  { %72 = vbcast.lane.b32.xlu0 %v70_v19, 256 }
  0x16   :  { %79 = vbcast.lane.b32.xlu1 %v77_v40, 256 }
  0x35   :  { %s1012_s8 = spop %1011 }
  0x7b   :  { %v31_v22 = vpop.permute.xlu0 %30 }
  0x7c   :  { %v85_v23 = vmul.f32 %v1116_v21, %v31_v22  ;;  %v45_v50 = vpop.permute.xlu1 %44 }
  0x7d   :  { %v87_v51 = vmul.f32 %v1116_v21, %v45_v50 }
  0x7e   :  { %v97_v25 = vadd.f32 %v1122_v24, %v85_v23 }
  0x7f   :  { %v38_v41 = vpop.permute.xlu0 %37  ;;  %v99_v52 = vadd.f32 %v1122_v24, %v87_v51 }
  0x80   :  { %v86_v42 = vmul.f32 %v1116_v21, %v38_v41  ;;  %v52_v59 = vpop.permute.xlu1 %51 }
  0x81   :  { %v88_v60 = vmul.f32 %v1116_v21, %v52_v59 }
  0x82   :  { %v98_v43 = vadd.f32 %v1122_v24, %v86_v42 }
  0x83   :  { %v100_v61 = vadd.f32 %v1122_v24, %v88_v60  ;;  %v59_v10 = vpop.permute.xlu0 %58 }
  0x84   :  { %v89_v11 = vmul.f32 %v1116_v21, %v59_v10  ;;  %v66_v19 = vpop.permute.xlu1 %65 }
  0x85   :  { %v90_v20 = vmul.f32 %v1116_v21, %v66_v19 }
  0x86   :  { %v101_v12 = vadd.f32 %v1122_v24, %v89_v11 }
  0x87   :  { %v102_v22 = vadd.f32 %v1122_v24, %v90_v20 }
  0x88   :  { %v80_v36 = vpop.permute.xlu1 %79 }
  0x89   :  { %v92_v37 = vmul.f32 %v1116_v21, %v80_v36 }
  0x8b   :  { %v104_v38 = vadd.f32 %v1122_v24, %v92_v37 }
  0xde   :  { %v176_v26 = vpop.f32.mrb[0].mxu0 }
  0xdf   :  { %v180_v27 = vadd.f32 %v176_v26, %v97_v25  ;;  %v885_v28 = vpop.f32.mrb[1].mxu0 }
  0xe1   :  { %1016 = vtanh.f32 %v180_v27 }
  0xeb   :  { %v1017_v30 = vpop.eup %1016 }
  0xec   :  { %895 = vmatmul.mubr.msk.f32.vlgmr.msra.gmra.mrb[0].mxu1 %vm106_vm1, %v1017_v30  ;;  %v711_v31 = vmul.f32 %v1017_v30, %v1128_v29 }
  0xed   :  { %983 = vmatpush3.bf16.msra.mxu1 %v1072_v6  ;;  %916 = vmatprep.mubr.msk.f32.mxu1 %vm1033_vm0, %v1034_v4 }
  0xee   :  { %v720_v32 = vsel %vm719_vm2, %v711_v31, 0.0  ;;  %984 = vmatprep.subr.bf16.mxu1 %v1032_v0 }
  0xef   :  { %721 = vadd.xlane.f32.xlu0 %v720_v32 }
  0xf1   :  { %986 = vmatpush3.bf16.msra.mxu1 %v1084_v9 }
  0xf2   :  { %993 = vmatprep.subr.bf16.mxu1 %v1032_v0 }
 0x1bf   :  { %v251_v44 = vpop.f32.mrb[0].mxu1 }
 0x1c0   :  { %v255_v45 = vadd.f32 %v251_v44, %v98_v43  ;;  %v896_v46 = vpop.f32.mrb[1].mxu1 }
 0x1c2   :  { %1018 = vtanh.f32 %v255_v45 }
 0x1cc   :  { %v1019_v47 = vpop.eup %1018 }
 0x1cd   :  { %906 = vmatmul.mubr.msk.f32.vlgmr.msra.gmra.mrb[2].mxu0 %vm106_vm1, %v1019_v47  ;;  %v712_v48 = vmul.f32 %v1019_v47, %v1128_v29  ;;  %v765_v47 = vand.u32 127, %v25_v5 }
 0x1ce   :  { %989 = vmatpush3.bf16.msra.mxu0 %v1072_v6  ;;  %927 = vmatprep.mubr.msk.f32.mxu0 %vm1033_vm0, %v1034_v4 }
 0x1cf   :  { %v723_v49 = vsel %vm719_vm2, %v712_v48, 0.0  ;;  %990 = vmatprep.subr.bf16.mxu0 %v1032_v0 }
 0x1d0   :  { %724 = vadd.xlane.f32.xlu1 %v723_v49  ;;  %v746_v49 = vstv %s1012_s8 }
 0x1d2   :  { %992 = vmatpush3.bf16.msra.mxu0 %v1084_v9 }
 0x1d3   :  { %999 = vmatprep.subr.bf16.mxu0 %v1032_v0 }
 0x2a0   :  { %v326_v53 = vpop.f32.mrb[2].mxu0 }
 0x2a1   :  { %v330_v54 = vadd.f32 %v326_v53, %v99_v52  ;;  %v907_v55 = vpop.f32.mrb[3].mxu0  ;;  %v768_v53 = vsub.s32 %v765_v47, %v1081_v8 }
 0x2a3   :  { %1020 = vtanh.f32 %v330_v54 }
 0x2ad   :  { %v1021_v56 = vpop.eup %1020 }
 0x2ae   :  { %917 = vmatmul.mubr.msk.f32.vlgmr.msra.gmra.mrb[2].mxu1 %vm106_vm1, %v1021_v56  ;;  %v713_v57 = vmul.f32 %v1021_v56, %v1128_v29 }
 0x2af   :  { %995 = vmatpush3.bf16.msra.mxu1 %v1072_v6  ;;  %938 = vmatprep.mubr.msk.f32.mxu1 %vm1033_vm0, %v1034_v4 }
 0x2b0   :  { %v726_v58 = vsel %vm719_vm2, %v713_v57, 0.0  ;;  %996 = vmatprep.subr.bf16.mxu1 %v1032_v0 }
 0x2b1   :  { %727 = vadd.xlane.f32.xlu0 %v726_v58 }
 0x2b3   :  { %998 = vmatpush3.bf16.msra.mxu1 %v1084_v9 }
 0x2b4   :  { %1005 = vmatprep.subr.bf16.mxu1 %v1032_v0 }
 0x381   :  { %v401_v62 = vpop.f32.mrb[2].mxu1 }
 0x382   :  { %v405_v63 = vadd.f32 %v401_v62, %v100_v61  ;;  %v918_v1 = vpop.f32.mrb[3].mxu1 }
 0x384   :  { %1022 = vtanh.f32 %v405_v63 }
 0x38e   :  { %v1023_v2 = vpop.eup %1022 }
 0x38f   :  { %928 = vmatmul.mubr.msk.f32.vlgmr.msra.gmra.mrb[4].mxu0 %vm106_vm1, %v1023_v2  ;;  %v714_v3 = vmul.f32 %v1023_v2, %v1128_v29 }
 0x390   :  { %1001 = vmatpush3.bf16.msra.mxu0 %v1072_v6  ;;  %949 = vmatprep.mubr.msk.f32.mxu0 %vm1033_vm0, %v1034_v4 }
 0x391   :  { %v729_v7 = vsel %vm719_vm2, %v714_v3, 0.0  ;;  %1002 = vmatprep.subr.bf16.mxu0 %v1032_v0 }
 0x392   :  { %730 = vadd.xlane.f32.xlu0 %v729_v7 }
 0x394   :  { %1004 = vmatpush3.bf16.msra.mxu0 %v1084_v9 }
 0x462   :  { %v476_v13 = vpop.f32.mrb[4].mxu0 }
 0x463   :  { %v480_v14 = vadd.f32 %v476_v13, %v101_v12  ;;  %v929_v15 = vpop.f32.mrb[5].mxu0 }
 0x465   :  { %1024 = vtanh.f32 %v480_v14 }
 0x46f   :  { %v1025_v16 = vpop.eup %1024 }
 0x470   :  { %939 = vmatmul.mubr.msk.f32.vlgmr.msra.gmra.mrb[4].mxu1 %vm106_vm1, %v1025_v16  ;;  %v715_v17 = vmul.f32 %v1025_v16, %v1128_v29 }
 0x471   :  { %1007 = vmatpush3.bf16.msra.mxu1 %v1072_v6  ;;  %960 = vmatprep.mubr.msk.f32.mxu1 %vm1033_vm0, %v1034_v4 }
 0x472   :  { %v732_v18 = vsel %vm719_vm2, %v715_v17, 0.0  ;;  %1008 = vmatprep.subr.bf16.mxu1 %v1032_v0  ;;  %v73_v0 = vpop.permute.xlu0 %72 }
 0x473   :  { %733 = vadd.xlane.f32.xlu1 %v732_v18 }
 0x475   :  { %1010 = vmatpush3.bf16.msra.mxu1 %v1084_v9  ;;  %v91_v9 = vmul.f32 %v1116_v21, %v73_v0  ;;  %v725_v21 = vpop.xlane.xlu1 %724 }
 0x476   :  { %v722_v45 = vpop.xlane.xlu0 %721  ;;  %v749_v50 = vadd.f32 %v746_v49, %v725_v21 }
 0x477   :  { %v103_v28 = vadd.f32 %v1122_v24, %v91_v9  ;;  %v748_v54 = vadd.f32 %v746_v49, %v722_v45 }
 0x478   :  { %v773_v57 = vrot.slane %v749_v50, %v768_v53 }
 0x479   :  { %v769_v61 = vrot.slane %v748_v54, %v768_v53 }
 0x47a   :  { %v728_v46 = vpop.xlane.xlu0 %727 }
 0x47b   :  { %v750_v51 = vadd.f32 %v746_v49, %v728_v46  ;;  %v799_v63 = vsel %vm798_vm3, %v773_v57, %v769_v61 }
 0x47d   :  { %v777_v59 = vrot.slane %v750_v51, %v768_v53 }
 0x47e   :  { %v731_v24 = vpop.xlane.xlu0 %730 }
 0x47f   :  { %v751_v55 = vadd.f32 %v746_v49, %v731_v24  ;;  %v801_v2 = vsel %vm800_vm4, %v777_v59, %v799_v63 }
 0x481   :  { %v781_v62 = vrot.slane %v751_v55, %v768_v53 }
 0x483   :  { %v803_v7 = vsel %vm802_vm5, %v781_v62, %v801_v2 }
 0x500   :  { %v734_v48 = vpop.xlane.xlu1 %733 }
 0x501   :  { %v752_v56 = vadd.f32 %v746_v49, %v734_v48 }
 0x503   :  { %v785_v5 = vrot.slane %v752_v56, %v768_v53 }
 0x505   :  { %v805_v11 = vsel %vm804_vm6, %v785_v5, %v803_v7 }
 0x543   :  { %v551_v23 = vpop.f32.mrb[4].mxu1 }
 0x544   :  { %v555_v25 = vadd.f32 %v551_v23, %v102_v22  ;;  %v940_v26 = vpop.f32.mrb[5].mxu1 }
 0x546   :  { %1026 = vtanh.f32 %v555_v25 }
 0x550   :  { %v1027_v6 = vpop.eup %1026 }
 0x551   :  { %950 = vmatmul.mubr.msk.f32.vlgmr.msra.gmra.mrb[6].mxu0 %vm106_vm1, %v1027_v6  ;;  %v716_v4 = vmul.f32 %v1027_v6, %v1128_v29 }
 0x553   :  { %v735_v27 = vsel %vm719_vm2, %v716_v4, 0.0 }
 0x554   :  { %736 = vadd.xlane.f32.xlu0 %v735_v27 }
 0x5e1   :  { %v737_v52 = vpop.xlane.xlu0 %736 }
 0x5e2   :  { %v753_v58 = vadd.f32 %v746_v49, %v737_v52 }
 0x5e4   :  { %v789_v1 = vrot.slane %v753_v58, %v768_v53 }
 0x5e6   :  { %v807_v12 = vsel %vm806_vm7, %v789_v1, %v805_v11 }
 0x624   :  { %v626_v30 = vpop.f32.mrb[6].mxu0 }
 0x625   :  { %v630_v31 = vadd.f32 %v626_v30, %v103_v28  ;;  %v951_v32 = vpop.f32.mrb[7].mxu0 }
 0x627   :  { %1028 = vtanh.f32 %v630_v31 }
 0x631   :  { %v1029_v33 = vpop.eup %1028 }
 0x632   :  { %961 = vmatmul.mubr.msk.f32.vlgmr.msra.gmra.mrb[6].mxu1 %vm106_vm1, %v1029_v33  ;;  %v717_v34 = vmul.f32 %v1029_v33, %v1128_v29 }
 0x634   :  { %v738_v35 = vsel %vm719_vm2, %v717_v34, 0.0 }
 0x635   :  { %739 = vadd.xlane.f32.xlu1 %v738_v35 }
 0x705   :  { %v701_v39 = vpop.f32.mrb[6].mxu1 }
 0x706   :  { %v705_v40 = vadd.f32 %v701_v39, %v104_v38  ;;  %v962_v41 = vpop.f32.mrb[7].mxu1 }
 0x708   :  { %1030 = vtanh.f32 %v705_v40 }
 0x712   :  { %v1031_v42 = vpop.eup %1030 }
 0x713   :  { %815 = vst.msk [vmem:[%s1211_s4] sm:$0x3] %vm719_vm2, %v1031_v42  ;;  %v718_v43 = vmul.f32 %v1031_v42, %v1128_v29  ;;  %v740_v29 = vpop.xlane.xlu1 %739 }
 0x714   :  { %v754_v60 = vadd.f32 %v746_v49, %v740_v29 }
 0x715   :  { %v741_v44 = vsel %vm719_vm2, %v718_v43, 0.0 }
 0x716   :  { %742 = vadd.xlane.f32.xlu0 %v741_v44  ;;  %v793_v8 = vrot.slane %v754_v60, %v768_v53 }
 0x718   :  { %v809_v14 = vsel %vm808_vm8, %v793_v8, %v807_v12 }
 0x7a3   :  { %v743_v3 = vpop.xlane.xlu0 %742 }
 0x7a4   :  { %v755_v10 = vadd.f32 %v746_v49, %v743_v3 }
 0x7a6   :  { %v797_v13 = vrot.slane %v755_v10, %v768_v53 }
 0x7a8   :  { %v811_v15 = vsel %vm810_vm9, %v797_v13, %v809_v14 }
 0x7a9   :  { %814 = vst.msk [vmem:[%s1212_s3] sm:$0xff] %vm813_vm10, %v811_v15 }

</bundles_post_ra>
